<compile_context>
chip_gen: v6e
topology: v6e:2x2x1
jax: 0.10.0
libtpu: 0.0.40
codegen_flags: <defaults>
</compile_context>

<pallas_src>
import functools

import jax
import jax.numpy as jnp
from jax.experimental import pallas as pl
from jax.experimental.pallas import tpu as pltpu


_TARGET_STEP_BYTES = 2 * 1024 * 1024   # ~2 MiB/step: amortizes ~0.35us step overhead.
_WHOLE_C_CAP_BYTES = 4 * 1024 * 1024   # whole-C tiles allowed up to 4 MiB/step
                                       # (<= 8 MiB double-buffered on all generations).


def _cdiv(a, b):
    return -(-a // b)


def _pick_channel_tile(B, C, L, n_shifts, dtype):
    """Channel-tile size: sublane-aligned, sized by bytes-per-step, prefers tc == C."""
    itemsize = jnp.dtype(dtype).itemsize
    sub = max(8, 32 // itemsize)               # f32 -> 8, bf16 -> 16, int8/fp8 -> 32
    row_bytes = L * (1 + n_shifts) * itemsize  # one input row + n output rows

    if C * row_bytes <= _WHOLE_C_CAP_BYTES:
        # Whole-C tile: the output writeback is one contiguous HBM region per step.
        tc = C
    else:
        tc = max(sub, (_TARGET_STEP_BYTES // row_bytes) // sub * sub)
        tc = min(tc, C)

    # v7x shards "parallel" grid axes across its 2 TensorCores: make sure there are
    # at least 2 grid steps whenever the shape allows it (harmless on v5e/v6e).
    if B * _cdiv(C, tc) < 2 and C >= 2 * sub:
        tc = _cdiv(_cdiv(C, 2), sub) * sub

    return tc


def _make_shift_kernel(shifts, L):
    """Kernel: x block (1, tc, L) -> out block (1, n_shifts, tc, L)."""

    def kernel(x_ref, o_ref):
        for i, s in enumerate(shifts):          # static unroll; n_shifts is small
            sh = s % L                          # python mod -> static shift in [0, L)
            if sh == 0:
                o_ref[0, i] = x_ref[0]
            else:
                # Re-read x_ref per shift: short vreg live range, no spills; the
                # kernel is HBM-bound so the extra vld is hidden.
                xv = x_ref[0]                   # (tc, L), native dtype — no upcast
                if L % 128 == 0:
                    # torch.roll / jnp.roll convention: out[..., j] = x[..., (j-sh) % L].
                    # pltpu.roll matches jnp.roll's sign (checked against the reference
                    # below); one XLU rotation per vreg, no VMEM temporaries.
                    o_ref[0, i] = pltpu.roll(xv, shift=sh, axis=1)
                else:
                    # Non-lane-aligned L: fall back to the 2-slice rotation.
                    o_ref[0, i] = jnp.concatenate(
                        [xv[:, L - sh:], xv[:, :L - sh]], axis=-1)

    return kernel


@functools.partial(jax.jit, static_argnames=("shifts",))
def locality_invariant_shifting(x, *, shifts):
    """Forward of LocalityInvariantShifting.

    x: (B, C, L).  Returns (B, len(shifts) * C, L) with
      out[:, i*C:(i+1)*C, :] = roll(x, shifts[i], axis=-1)
    """
    shifts = tuple(int(s) for s in shifts)
    B, C, L = x.shape
    n = len(shifts)
    itemsize = jnp.dtype(x.dtype).itemsize

    tc = _pick_channel_tile(B, C, L, n, x.dtype)
    c_tiles = _cdiv(C, tc)

    out4 = pl.pallas_call(
        _make_shift_kernel(shifts, L),
        out_shape=jax.ShapeDtypeStruct((B, n, C, L), x.dtype),
        grid=(B, c_tiles),
        in_specs=[pl.BlockSpec((1, tc, L), lambda b, c: (b, c, 0))],
        out_specs=pl.BlockSpec((1, n, tc, L), lambda b, c: (b, 0, c, 0)),
        compiler_params=pltpu.CompilerParams(
            dimension_semantics=("parallel", "parallel"),
        ),
        cost_estimate=pl.CostEstimate(
            flops=0,
            transcendentals=0,
            bytes_accessed=(x.size + B * n * C * L) * itemsize,
        ),
    )(x)

    # (B, n, C, L) -> (B, n*C, L): identical memory order to torch.cat(dim=1).
    return out4.reshape(B, n * C, L)


if __name__ == "__main__":
    # NOTE: these shapes are deliberately tiny correctness checks; the tiling /
    # bandwidth wins only show at production sizes where MBs stream through HBM.
    def reference(x, shifts):
        return jnp.concatenate([jnp.roll(x, s, axis=-1) for s in shifts], axis=1)

    cases = [
        # (B, C, L, dtype, shifts)
        (2, 4, 128, jnp.float32, (0, 1, -3, 7)),    # demo shape; whole-C tile, grid (2,1)
        (1, 64, 128, jnp.float32, (5, -17)),        # B=1 -> tile halved for v7x 2-TC path
        (2, 16, 256, jnp.bfloat16, (-1, 4, 131)),   # bf16, L > 128 (cross-vreg rotation)
    ]

    key = jax.random.PRNGKey(0)
    for (B, C, L, dtype, shifts) in cases:
        key, sub = jax.random.split(key)
        x = jax.random.normal(sub, (B, C, L), dtype=jnp.float32).astype(dtype)

        out = jax.block_until_ready(locality_invariant_shifting(x, shifts=shifts))
        expect = reference(x, shifts)

        assert out.shape == (B, len(shifts) * C, L), (out.shape,)
        assert jnp.array_equal(out, expect), (
            f"mismatch vs roll+concat reference for case {(B, C, L, str(dtype), shifts)}"
        )

    print("KERNEL_OK")
</pallas_src>

<mosaic_0001>
module attributes {stable_mosaic.version = 11 : i64} {
  func.func @kernel(%arg0: i32, %arg1: i32, %arg2: memref<1x4x128xf32, #tpu.memory_space<vmem>>, %arg3: memref<1x4x4x128xf32, #tpu.memory_space<vmem>>) attributes {dimension_semantics = [#tpu.dimension_semantics<parallel>, #tpu.dimension_semantics<parallel>], iteration_bounds = array<i64: 2, 1>, scalar_prefetch = 0 : i64, scratch_operands = 0 : i64, tpu.core_type = #tpu.core_type<tc>, window_params = [{transform_indices = @transform_0, window_bounds = array<i64: 1, 4, 128>}, {transform_indices = @transform_1, window_bounds = array<i64: 1, 4, 4, 128>}]} {
    %c0 = arith.constant 0 : index
    %c0_0 = arith.constant 0 : index
    %c0_1 = arith.constant 0 : index
    %0 = vector.load %arg2[%c0, %c0_0, %c0_1] : memref<1x4x128xf32, #tpu.memory_space<vmem>>, vector<1x4x128xf32>
    %1 = vector.shape_cast %0 : vector<1x4x128xf32> to vector<4x128xf32>
    %c0_2 = arith.constant 0 : index
    %c0_3 = arith.constant 0 : index
    %c0_4 = arith.constant 0 : index
    %c0_5 = arith.constant 0 : index
    %2 = vector.load %arg3[%c0_2, %c0_3, %c0_4, %c0_5] : memref<1x4x4x128xf32, #tpu.memory_space<vmem>>, vector<1x1x4x128xf32>
    %3 = vector.shape_cast %2 : vector<1x1x4x128xf32> to vector<4x128xf32>
    %4 = vector.shape_cast %1 : vector<4x128xf32> to vector<1x1x4x128xf32>
    tpu.vector_store %arg3[%c0_2, %c0_3, %c0_4, %c0_5], %4 {strides = array<i32>} : memref<1x4x4x128xf32, #tpu.memory_space<vmem>>, vector<1x1x4x128xf32>,
    %c0_6 = arith.constant 0 : index
    %c0_7 = arith.constant 0 : index
    %c0_8 = arith.constant 0 : index
    %5 = vector.load %arg2[%c0_6, %c0_7, %c0_8] : memref<1x4x128xf32, #tpu.memory_space<vmem>>, vector<1x4x128xf32>
    %6 = vector.shape_cast %5 : vector<1x4x128xf32> to vector<4x128xf32>
    %c1_i32 = arith.constant 1 : i32
    %7 = tpu.dynamic_rotate %6 by %c1_i32 dim 1 : vector<4x128xf32>, i32 -> vector<4x128xf32>
    %c0_9 = arith.constant 0 : index
    %c1 = arith.constant 1 : index
    %c0_10 = arith.constant 0 : index
    %c0_11 = arith.constant 0 : index
    %8 = vector.load %arg3[%c0_9, %c1, %c0_10, %c0_11] : memref<1x4x4x128xf32, #tpu.memory_space<vmem>>, vector<1x1x4x128xf32>
    %9 = vector.shape_cast %8 : vector<1x1x4x128xf32> to vector<4x128xf32>
    %10 = vector.shape_cast %7 : vector<4x128xf32> to vector<1x1x4x128xf32>
    tpu.vector_store %arg3[%c0_9, %c1, %c0_10, %c0_11], %10 {strides = array<i32>} : memref<1x4x4x128xf32, #tpu.memory_space<vmem>>, vector<1x1x4x128xf32>,
    %c0_12 = arith.constant 0 : index
    %c0_13 = arith.constant 0 : index
    %c0_14 = arith.constant 0 : index
    %11 = vector.load %arg2[%c0_12, %c0_13, %c0_14] : memref<1x4x128xf32, #tpu.memory_space<vmem>>, vector<1x4x128xf32>
    %12 = vector.shape_cast %11 : vector<1x4x128xf32> to vector<4x128xf32>
    %c125_i32 = arith.constant 125 : i32
    %13 = tpu.dynamic_rotate %12 by %c125_i32 dim 1 : vector<4x128xf32>, i32 -> vector<4x128xf32>
    %c0_15 = arith.constant 0 : index
    %c2 = arith.constant 2 : index
    %c0_16 = arith.constant 0 : index
    %c0_17 = arith.constant 0 : index
    %14 = vector.load %arg3[%c0_15, %c2, %c0_16, %c0_17] : memref<1x4x4x128xf32, #tpu.memory_space<vmem>>, vector<1x1x4x128xf32>
    %15 = vector.shape_cast %14 : vector<1x1x4x128xf32> to vector<4x128xf32>
    %16 = vector.shape_cast %13 : vector<4x128xf32> to vector<1x1x4x128xf32>
    tpu.vector_store %arg3[%c0_15, %c2, %c0_16, %c0_17], %16 {strides = array<i32>} : memref<1x4x4x128xf32, #tpu.memory_space<vmem>>, vector<1x1x4x128xf32>,
    %c0_18 = arith.constant 0 : index
    %c0_19 = arith.constant 0 : index
    %c0_20 = arith.constant 0 : index
    %17 = vector.load %arg2[%c0_18, %c0_19, %c0_20] : memref<1x4x128xf32, #tpu.memory_space<vmem>>, vector<1x4x128xf32>
    %18 = vector.shape_cast %17 : vector<1x4x128xf32> to vector<4x128xf32>
    %c7_i32 = arith.constant 7 : i32
    %19 = tpu.dynamic_rotate %18 by %c7_i32 dim 1 : vector<4x128xf32>, i32 -> vector<4x128xf32>
    %c0_21 = arith.constant 0 : index
    %c3 = arith.constant 3 : index
    %c0_22 = arith.constant 0 : index
    %c0_23 = arith.constant 0 : index
    %20 = vector.load %arg3[%c0_21, %c3, %c0_22, %c0_23] : memref<1x4x4x128xf32, #tpu.memory_space<vmem>>, vector<1x1x4x128xf32>
    %21 = vector.shape_cast %20 : vector<1x1x4x128xf32> to vector<4x128xf32>
    %22 = vector.shape_cast %19 : vector<4x128xf32> to vector<1x1x4x128xf32>
    tpu.vector_store %arg3[%c0_21, %c3, %c0_22, %c0_23], %22 {strides = array<i32>} : memref<1x4x4x128xf32, #tpu.memory_space<vmem>>, vector<1x1x4x128xf32>,
    return
  }
  func.func @transform_0(%arg0: i32, %arg1: i32) -> (i32, i32, i32) {
    %c0_i32 = arith.constant 0 : i32
    %c0_i32_0 = arith.constant 0 : i32
    return %arg0, %arg1, %c0_i32 : i32, i32, i32
  }
  func.func @transform_1(%arg0: i32, %arg1: i32) -> (i32, i32, i32, i32) {
    %c0_i32 = arith.constant 0 : i32
    %c0_i32_0 = arith.constant 0 : i32
    %c0_i32_1 = arith.constant 0 : i32
    return %arg0, %c0_i32, %arg1, %c0_i32_0 : i32, i32, i32, i32
  }
}

</mosaic_0001>

<bundles_post_ra>
// kernel: locality_invariant_shifting.1
= control target key start
LH: loop header
LB: loop body
LE: loop exit
PB: predicated region body
PF: predicated region fallthrough
CT: control target
= control target key end

     0   :  { %6 = vsyncpa [#allocation3], 0  ;;  %s626_s0 = inlined_call_operand.hbm [shape: f32[2,4,128], index: 0, kind: input, shape index: {}]   ;;  %s627_s1 = inlined_call_operand.hbm [shape: f32[2,4,4,128], index: 1, kind: output, shape index: {}]  }
   0x1   :  { %8 = vsyncpa [#allocation3 + $0x1], 0 }
   0x2   :  { %9 = vsyncpa [#allocation4], 0 }
   0x3   :  { %11 = vsyncpa [#allocation4 + $0x1], 0  ;;  %s477_s6 = smov 0   ;;  %s479_s7 = smov 0  }
   0x4   :  { %s481_s8 = smov 0   ;;  %s483_s9 = smov 0  }
   0x5   :  { %s485_s10 = smov 0   ;;  %s487_s11 = smov 0  }
   0x6 LB: > { %s265_s12 = sadd.s32 4294967295, %s458_s11   ;;  %s266_s13 = sadd.s32 4294967294, %s458_s11   ;;  %s458_s11 = sphi %s487_s11, %s17_s11   ;;  %s454_s10 = sphi %s485_s10, %s639_s10   ;;  %s450_s9 = sphi %s483_s9, %s638_s9   ;;  %s446_s8 = sphi %s481_s8, %s637_s8   ;;  %s442_s7 = sphi %s479_s7, %s636_s7   ;;  %s438_s6 = sphi %s477_s6, %s635_s6  }
   0x7   : > { %s29_s14 = sadd.s32 1, %s454_s10  ;;  %s38_s15 = sadd.s32 1, %s446_s8 }
   0x8   : > { %p31_p0 = scmp.ge.s32.totalorder %s29_s14, 2  ;;  %p45_p1 = scmp.ne.s32.totalorder %s446_s8, %s442_s7 }
   0x9   : > { %p46_p2 = scmp.eq.s32.totalorder %s458_s11, 0  ;;  %p51_p3 = scmp.ne.s32.totalorder %s442_s7, %s438_s6 }
   0xa   : > { %s641_s14 = smov (%p31_p0, %s29_s14), 0  ;;  %p52_p5 = scmp.eq.s32.totalorder %s265_s12, 0 }
   0xb   : > { %p518_p4 = por %p46_p2, %p45_p1  ;;  %s33_s17 = ssub.s32 %s454_s10, %s641_s14 }
   0xc   : > { %p77_p6 = scmp.eq.s32.totalorder %s265_s12, 1  ;;  %p36_p7 = scmp.eq.s32.totalorder %s33_s17, 0 }
   0xd   : > { %p524_p8 = por %p52_p5, %p51_p3  ;;  %p83_p10 = scmp.eq.s32.totalorder %s266_s13, 1 }
   0xe   : > { %p528_p9 = por %p77_p6, %p45_p1  ;;  %p295_p13 = scmp.lt.s32.totalorder %s458_s11, 2 }
   0xf   : > { %s533_s20 = scalar_select %p36_p7, %s446_s8, %s38_s15  }
  0x10   : > { %p535_p11 = por %p83_p10, %p51_p3  ;;  %s103_s22 = sand.u32 1, %s446_s8  }
  0x11   : > { %s269_s23 = sshll.u32 %s103_s22, 2  ;;  %s270_s24 = sshll.u32 %s454_s10, 6 }
  0x12   : > { %s631_s21 = scalar_select %p535_p11, 1, 0 }
  0x13   : > { %s113_s27 = scalar_lea.hbm %s626_s0, %s270_s24  ;;  %s107_s28 = scalar_lea.vmem [#allocation2], %s269_s23 }
  0x14   : > { %s115_s29 = sshll.u32 %s107_s28, 4  ;;  %p548_p0 = pnand %p295_p13, %p518_p4  ;;  %s116_s29 = int_to_ptr.vmem [resolvable:$true] %s115_s29 }
  0x15   : > { %p271_p1 = scmp.ge.s32.totalorder %s458_s11, 1  ;;  %p120_p2 = scmp.lt.s32.totalorder %s458_s11, 3 }
  0x16   : > { %s104_s2 = scalar_lea.sflag [#allocation3], %s103_s22  ;;  %p352_p3 = pneg %p548_p0 }
  0x17   : > { %s363_s3 = scalar_lea.vmem %s116_s29, 64  ;;  %s460_s4 = smov [#allocation2]  }
  0x18   : > { %p364_p5 = scmp.ne.s32.totalorder %s116_s29, %s363_s3  ;;  %s368_s5 = sshll.u32 %s460_s4, 4  ;;  %s369_s5 = int_to_ptr.vmem [resolvable:$false] %s368_s5 }
  0x19   : > { %s370_s12 = scalar_lea.vmem %s369_s5, 128  ;;  %p371_p10 = scmp.lt.s32.totalorder %s116_s29, %s369_s5 }
  0x1a   : > { %p366_p6 = pnand %p364_p5, %p352_p3  ;;  %p372_p12 = scmp.lt.s32.totalorder %s370_s12, %s363_s3 }
  0x1c   : > { %p367_p7 = pneg %p366_p6  ;;  %p373_p4 = por %p372_p12, %p371_p10 }
  0x1e   : > { %p374_p13 = pnand %p373_p4, %p367_p7 }
  0x20   : > { %377 = shalt.err (!%p374_p13)
}
  0x21   : > { %290 = dma.hbm_to_vmem [thread:$0]  (!%p548_p0), %s113_s27, 64, %s116_s29, %s104_s2  }
  0x22   : > { %p121_p11 = pnand %p271_p1, %p120_p2 }
  0x23   : > { %s563_s13 = sand.u32 (!%p121_p11), 1, %s442_s7  }
  0x24   : > { %124 = sbr.rel (%p121_p11) target bundleno = 176 (0xb0), region = 24  ;;  %s272_s15 = sshll.u32 (!%p121_p11), %s563_s13, 2 }
  0x25   : > { %s127_s16 = scalar_lea.sflag (!%p121_p11), [#allocation3], %s563_s13  ;;  %s130_s17 = scalar_lea.vmem (!%p121_p11), [#allocation2], %s272_s15 }
  0x29   : > { %429 = dma.done.wait (%p524_p8), %s127_s16, 64  }
  0x2a   : > { %431 = vsyncadd (%p524_p8), %s127_s16, 4294967232  ;;  %s273_s22 = sshll.u32 %s563_s13, 4  ;;  %v151_v0 = vld [vmem:[%s130_s17] sm:$0xf]  ;;  %s461_s23 = smov 1  }
  0x2b   : > { %v161_v1 = vld [vmem:[%s130_s17] sm:$0xf]  ;;  %152 = vrot.lane.b32.xlu0 %v151_v0, %s461_s23  ;;  %s462_s24 = smov 7   ;;  %s148_s25 = scalar_lea.vmem [#allocation5], %s273_s22 }
  0x2c   : > { %162 = vrot.lane.b32.xlu1 %v161_v1, %s462_s24  ;;  %v149_v2 = vld [vmem:[%s130_s17] sm:$0xf]  ;;  %s463_s26 = smov 125   ;;  %s181_s27 = sshll.u32 %s148_s25, 4  ;;  %s573_s27 = int_to_ptr.vmem [resolvable:$true] %s181_s27 }
  0x2d   : > { %v156_v3 = vld [vmem:[%s130_s17] sm:$0xf]  ;;  %150 = vst [vmem:[%s148_s25] sm:$0xf] %v149_v2  ;;  %s282_s18 = sshll.u32 %s450_s9, 8  ;;  %s167_s2 = scalar_lea.sflag [#allocation4], %s563_s13 }
  0x2e   : > { %s578_s30 = scalar_lea.hbm %s627_s1, %s282_s18  ;;  %s378_s3 = scalar_lea.vmem %s573_s27, 256 }
  0x2f   : > { %157 = vrot.lane.b32.xlu0 %v156_v3, %s463_s26  ;;  %p379_p8 = scmp.ne.s32.totalorder %s573_s27, %s378_s3  ;;  %s464_s9 = smov [#allocation5]  }
  0x30   : > { %s382_s4 = sshll.u32 %s464_s9, 4  ;;  %s383_s4 = int_to_ptr.vmem [resolvable:$false] %s382_s4 }
  0x31   : > { %p380_p11 = pnand %p379_p8, %p528_p9  ;;  %s384_s5 = scalar_lea.vmem %s383_s4, 512 }
  0x32   : > { %p385_p0 = scmp.lt.s32.totalorder %s573_s27, %s383_s4  ;;  %p386_p1 = scmp.lt.s32.totalorder %s384_s5, %s378_s3 }
  0x33   : > { %p381_p12 = pneg %p380_p11 }
  0x34   : > { %p387_p2 = por %p386_p1, %p385_p0 }
  0x36   : > { %p388_p3 = pnand %p387_p2, %p381_p12 }
  0x9d   : > { %v153_v4 = vpop.permute.xlu0 %152 }
  0x9e   : > { %v163_v5 = vpop.permute.xlu1 %162  ;;  %274 = vst [vmem:[%s148_s25 + $0x4] sm:$0xf] %v153_v4 }
  0x9f   : > { %276 = vst [vmem:[%s148_s25 + $0xc] sm:$0xf] %v163_v5 }
  0xa1   : > { %v158_v6 = vpop.permute.xlu0 %157 }
  0xa2   : > { %275 = vst [vmem:[%s148_s25 + $0x8] sm:$0xf] %v158_v6 }
  0xa3   : > { %391 = shalt.err (!%p388_p3)
}
  0xa4   : > { %s392_s12 = scalar_lea.hbm %s578_s30, 256  ;;  %s396_s17 = scalar_lea.hbm %s627_s1, 512 }
  0xa5   : > { %p393_p5 = scmp.ne.s32.totalorder %s578_s30, %s392_s12  ;;  %p397_p10 = scmp.lt.s32.totalorder %s578_s30, %s627_s1 }
  0xa6   : > { %p398_p4 = scmp.lt.s32.totalorder %s396_s17, %s392_s12 }
  0xa7   : > { %p394_p6 = pnand %p393_p5, %p528_p9 }
  0xa8   : > { %p399_p13 = por %p398_p4, %p397_p10 }
  0xa9   : > { %p395_p7 = pneg %p394_p6 }
  0xab   : > { %p400_p8 = pnand %p399_p13, %p395_p7 }
  0xad   : > { %403 = shalt.err (!%p400_p8)
}
  0xae   : > { %s465_s24 = smov 64   ;;  %s466_s25 = smov 4  }
  0xaf   : > { %285 = dma.vmem_to_hbm [thread:$0]  (%p528_p9), %s573_s27, 256, %s578_s30, %s167_s2, %s465_s24, %s465_s24, %s466_s25  }
  0xb0 PF: > { %s196_s26 = sand.u32 1, %s438_s6   ;;  %p633_p11 = scmp.ne.s32.totalorder %s631_s21, 0 }
  0xb1   : > { %p634_p12 = scmp.ge.s32.totalorder %s458_s11, 2  ;;  %s197_s18 = scalar_lea.sflag [#allocation4], %s196_s26 }
  0xb3   : > { %p292_p0 = pnand %p634_p12, %p633_p11 }
  0xb5   : > { %p293_p1 = pneg %p292_p0 }
  0xb7   : > { %433 = dma.done.wait (%p293_p1), %s197_s18, 256  }
  0xb8   : > { %435 = vsyncadd (%p293_p1), %s197_s18, 4294967040  ;;  %s17_s11 = sadd.s32 1, %s458_s11   ;;  %s635_s6 = smov %s442_s7 }
  0xb9   : > { %p14_p2 = scmp.ge.s32.totalorder %s17_s11, 4   ;;  %s636_s7 = smov %s446_s8 }
  0xba   : > { %s637_s8 = smov %s533_s20  ;;  %s638_s9 = smov %s454_s10 }
  0xbb   : > { %s639_s10 = smov %s641_s14  ;;  %16 = sbr.rel (!%p14_p2) target bundleno = 6 (0x6), region = 72 }
  0xc0   :  { %202 = vsyncpa [#allocation3], 1 }
  0xc1   :  { %204 = vsyncpa [#allocation3 + $0x1], 1 }
  0xc2   :  { %205 = vsyncpa [#allocation4], 1 }
  0xc3   :  { %207 = vsyncpa [#allocation4 + $0x1], 1 }

</bundles_post_ra>
